<compile_context>
chip_gen: v7x
topology: tpu7x:2x2x1
jax: 0.10.0
libtpu: 0.0.40
codegen_flags: <defaults>
</compile_context>

<pallas_src>
import functools

import jax
import jax.numpy as jnp
from jax import lax
from jax.experimental import pallas as pl
from jax.experimental.pallas import tpu as pltpu


def _round_up(n, m):
    return ((n + m - 1) // m) * m


# ---------------------------------------------------------------------------
# Narrow-output path (out_features == 1, full K resident in VMEM):
# VPU multiply + a single XLU lane reduction per M tile. No K loop, no
# accumulator scratch. Weight is DMA'd once (constant index_map); bias is a
# scalar in SMEM.
# ---------------------------------------------------------------------------
def _linear_vpu_kernel(x_ref, w_ref, b_ref, o_ref):
    x = x_ref[...].astype(jnp.float32)            # (tm, K)
    w = w_ref[...].astype(jnp.float32)            # (1, K) broadcast over rows
    y = jnp.sum(x * w, axis=-1, keepdims=True) + b_ref[0, 0]
    o_ref[...] = y.astype(o_ref.dtype)


# ---------------------------------------------------------------------------
# General MXU path, full K in one block: no accumulator loop, no scratch.
# grid = (M tiles, N tiles); both axes "parallel".
# ---------------------------------------------------------------------------
def _linear_mxu_fullk_kernel(x_ref, w_ref, b_ref, o_ref):
    acc = lax.dot_general(
        x_ref[...], w_ref[...],
        dimension_numbers=(((1,), (1,)), ((), ())),   # contract K of x with K of w
        preferred_element_type=jnp.float32)
    o_ref[...] = (acc + b_ref[...].astype(jnp.float32)).astype(o_ref.dtype)


# ---------------------------------------------------------------------------
# General MXU path with K tiling (only when full K does not fit the VMEM
# budget): f32 accumulator, K innermost "arbitrary" axis, pl.when
# init/finalize. The ragged K tail of x is masked in-kernel (x is never padded
# on the host); only the small weight is zero-padded along K.
# ---------------------------------------------------------------------------
def _linear_mxu_acc_kernel(x_ref, w_ref, b_ref, o_ref, acc_ref, *,
                           k_total, tk, mask_k):
    k = pl.program_id(2)

    @pl.when(k == 0)
    def _():
        acc_ref[...] = jnp.zeros_like(acc_ref)

    x = x_ref[...]
    if mask_k:  # static Python flag: only emitted when K % tk != 0
        col = lax.broadcasted_iota(jnp.int32, x.shape, 1) + k * tk
        x = jnp.where(col < k_total, x, jnp.zeros_like(x))

    acc_ref[...] += lax.dot_general(
        x, w_ref[...],
        dimension_numbers=(((1,), (1,)), ((), ())),
        preferred_element_type=jnp.float32)

    @pl.when(k == pl.num_programs(2) - 1)
    def _():
        o_ref[...] = (acc_ref[...] + b_ref[...].astype(jnp.float32)).astype(o_ref.dtype)


def linear_forward(x, weight, bias, *, tm=512, tn=512, tk=1024,
                   vmem_budget_bytes=40 * 1024 * 1024):
    """y = x @ weight.T + bias  (exact nn.Linear semantics).

    x: (batch, in_features), weight: (out_features, in_features),
    bias: (out_features,).
    """
    batch, in_features = x.shape
    out_features, in_features_w = weight.shape
    assert in_features_w == in_features, "weight must be (out_features, in_features)"
    out_dtype = x.dtype
    itemsize = 4  # footprint accounting in f32

    compiler_kwargs = dict(vmem_limit_bytes=48 * 1024 * 1024)  # safe on v7x (64 MiB)

    # M tiling: never pad/copy x on the host. A ragged last M block only feeds
    # garbage rows that Pallas discards on output write-back.
    tm_eff = batch if batch <= tm else tm
    gm = pl.cdiv(batch, tm_eff)
    # TODO(synk): on v7x, when the parallel grid collapses to a single block,
    # split M across the two TensorCores (needs chip detection); skipped here.

    # ------------------- narrow VPU path (out_features == 1) -------------------
    # ~2x double-buffered x tile + product temp + slack must fit the budget.
    vpu_footprint = 4 * itemsize * tm_eff * in_features
    if out_features == 1 and vpu_footprint <= vmem_budget_bytes:
        w2 = weight.reshape(1, in_features)
        b2 = bias.astype(jnp.float32).reshape(1, 1)
        out = pl.pallas_call(
            _linear_vpu_kernel,
            out_shape=jax.ShapeDtypeStruct((batch, 1), out_dtype),
            grid_spec=pltpu.PrefetchScalarGridSpec(
                num_scalar_prefetch=0,
                grid=(gm,),
                in_specs=[
                    pl.BlockSpec((tm_eff, in_features), lambda i: (i, 0)),
                    pl.BlockSpec((1, in_features), lambda i: (0, 0)),      # resident W
                    pl.BlockSpec(memory_space=pltpu.MemorySpace.SMEM),     # scalar bias
                ],
                out_specs=pl.BlockSpec((tm_eff, 1), lambda i: (i, 0)),
            ),
            compiler_params=pltpu.CompilerParams(
                dimension_semantics=("parallel",), **compiler_kwargs),
        )(x, w2, b2)
        return out

    # ------------------------- general MXU path -------------------------------
    n128 = _round_up(out_features, 128)   # lane-dense output stores

    def fp_fullk(tn_e):
        # double-buffered x tile + w tile + out tile, f32
        return 2 * itemsize * (tm_eff * in_features
                               + tn_e * in_features
                               + tm_eff * tn_e)

    # Prefer a whole-N weight block with full K: W and bias get a constant block
    # index, so they are DMA'd into VMEM exactly once, and there is no K loop.
    if n128 <= 1024 and fp_fullk(n128) <= vmem_budget_bytes:
        tn_eff, k_tiled = n128, False
    else:
        tn_eff = min(tn, n128)
        k_tiled = fp_fullk(tn_eff) > vmem_budget_bytes
    n_pad = _round_up(out_features, tn_eff)

    # Host-pad only the (small) weight/bias — never x.
    w2 = weight
    b2 = bias.reshape(1, out_features)
    if n_pad != out_features:
        w2 = jnp.pad(w2, ((0, n_pad - out_features), (0, 0)))
        b2 = jnp.pad(b2, ((0, 0), (0, n_pad - out_features)))

    if not k_tiled:
        grid = (gm, n_pad // tn_eff)
        out = pl.pallas_call(
            _linear_mxu_fullk_kernel,
            out_shape=jax.ShapeDtypeStruct((batch, n_pad), out_dtype),
            grid_spec=pltpu.PrefetchScalarGridSpec(
                num_scalar_prefetch=0,
                grid=grid,
                in_specs=[
                    pl.BlockSpec((tm_eff, in_features), lambda i, j: (i, 0)),
                    pl.BlockSpec((tn_eff, in_features), lambda i, j: (j, 0)),
                    pl.BlockSpec((1, tn_eff), lambda i, j: (0, j)),
                ],
                out_specs=pl.BlockSpec((tm_eff, tn_eff), lambda i, j: (i, j)),
            ),
            compiler_params=pltpu.CompilerParams(
                dimension_semantics=("parallel", "parallel"), **compiler_kwargs),
        )(x, w2, b2)
    else:
        tk_eff = min(tk, _round_up(in_features, 128))
        k_pad = _round_up(in_features, tk_eff)
        gk = k_pad // tk_eff
        mask_k = (in_features % tk_eff) != 0
        if k_pad != in_features:
            # zero-pad the weight's K tail (x's K tail is masked in-kernel)
            w2 = jnp.pad(w2, ((0, 0), (0, k_pad - in_features)))
        kernel = functools.partial(_linear_mxu_acc_kernel,
                                   k_total=in_features, tk=tk_eff, mask_k=mask_k)
        grid = (gm, n_pad // tn_eff, gk)
        out = pl.pallas_call(
            kernel,
            out_shape=jax.ShapeDtypeStruct((batch, n_pad), out_dtype),
            grid_spec=pltpu.PrefetchScalarGridSpec(
                num_scalar_prefetch=0,
                grid=grid,
                in_specs=[
                    pl.BlockSpec((tm_eff, tk_eff), lambda i, j, k: (i, k)),
                    pl.BlockSpec((tn_eff, tk_eff), lambda i, j, k: (j, k)),
                    pl.BlockSpec((1, tn_eff), lambda i, j, k: (0, j)),
                ],
                out_specs=pl.BlockSpec((tm_eff, tn_eff), lambda i, j, k: (i, j)),
                scratch_shapes=[pltpu.VMEM((tm_eff, tn_eff), jnp.float32)],
            ),
            compiler_params=pltpu.CompilerParams(
                dimension_semantics=("parallel", "parallel", "arbitrary"),
                **compiler_kwargs),
        )(x, w2, b2)

    return out if n_pad == out_features else out[:, :out_features]


class LinearRegressionModelPallas:
    """Mirror of the PyTorch LinearRegressionModel using Pallas TPU kernels."""

    def __init__(self, input_size, output_size=1, key=None):
        if key is None:
            key = jax.random.PRNGKey(42)
        # nn.Linear default init: U(-1/sqrt(in), 1/sqrt(in)) for weight and bias.
        kw, kb = jax.random.split(key)
        bound = 1.0 / jnp.sqrt(jnp.float32(input_size))
        self.weight = jax.random.uniform(
            kw, (output_size, input_size), jnp.float32, -bound, bound)
        self.bias = jax.random.uniform(
            kb, (output_size,), jnp.float32, -bound, bound)

    def forward(self, x):
        return linear_forward(x, self.weight, self.bias)


if __name__ == "__main__":
    # --- Module-default small case: input_size=32, output_size=1 (VPU path) ---
    input_size, output_size, batch = 32, 1, 8
    key = jax.random.PRNGKey(0)
    kx, krest = jax.random.split(key)
    x = jax.random.normal(kx, (batch, input_size), dtype=jnp.float32)

    model = LinearRegressionModelPallas(input_size, output_size,
                                        key=jax.random.PRNGKey(42))
    y = jax.block_until_ready(model.forward(x))
    y_ref = x @ model.weight.T + model.bias
    assert y.shape == (batch, output_size)
    assert jnp.allclose(y, y_ref, atol=1e-5, rtol=1e-5)

    # --- MXU full-K path: multi-output, resident weight, lane-dense N pad ---
    b2, in2, out2 = 200, 1000, 100
    k1, k2, k3 = jax.random.split(krest, 3)
    x2 = jax.random.normal(k1, (b2, in2), dtype=jnp.float32)
    w2 = jax.random.normal(k2, (out2, in2), dtype=jnp.float32) * 0.02
    bias2 = jax.random.normal(k3, (out2,), dtype=jnp.float32)
    y2 = jax.block_until_ready(linear_forward(x2, w2, bias2))
    y2_ref = x2 @ w2.T + bias2
    assert y2.shape == (b2, out2)
    assert jnp.allclose(y2, y2_ref, atol=1e-2, rtol=1e-2)

    # --- MXU K-tiled accumulate path with ragged M blocks and in-kernel K-tail
    #     masking (forced via a tiny VMEM budget so the shapes stay small) ---
    y3 = jax.block_until_ready(
        linear_forward(x2, w2, bias2, tm=128, tk=256,
                       vmem_budget_bytes=1 << 20))
    assert y3.shape == (b2, out2)
    assert jnp.allclose(y3, y2_ref, atol=1e-2, rtol=1e-2)

    print("KERNEL_OK")
</pallas_src>

<mosaic_0001>
module attributes {stable_mosaic.version = 11 : i64} {
  func.func @_linear_vpu_kernel(%arg0: i32, %arg1: memref<8x32xf32, #tpu.memory_space<vmem>>, %arg2: memref<1x32xf32, #tpu.memory_space<vmem>>, %arg3: memref<1x1xf32, #tpu.memory_space<smem>>, %arg4: memref<8x1xf32, #tpu.memory_space<vmem>>) attributes {dimension_semantics = [#tpu.dimension_semantics<parallel>], iteration_bounds = array<i64: 1>, scalar_prefetch = 0 : i64, scratch_operands = 0 : i64, tpu.core_type = #tpu.core_type<tc>, window_params = [{transform_indices = @transform_0, window_bounds = array<i64: 8, 32>}, {pipeline_mode = #tpu.pipeline_mode<synchronous>, transform_indices = @transform_1, window_bounds = array<i64: 1, 32>}, {transform_indices = @transform_2, window_bounds = array<i64: 1, 1>}, {transform_indices = @transform_3, window_bounds = array<i64: 8, 1>}]} {
    %c0 = arith.constant 0 : index
    %c0_0 = arith.constant 0 : index
    %0 = vector.load %arg1[%c0, %c0_0] : memref<8x32xf32, #tpu.memory_space<vmem>>, vector<8x32xf32>
    %c0_1 = arith.constant 0 : index
    %c0_2 = arith.constant 0 : index
    %1 = vector.load %arg2[%c0_1, %c0_2] : memref<1x32xf32, #tpu.memory_space<vmem>>, vector<1x32xf32>
    %2 = vector.broadcast %1 : vector<1x32xf32> to vector<8x32xf32>
    %3 = arith.mulf %0, %2 : vector<8x32xf32>
    %cst = arith.constant dense<0.000000e+00> : vector<8xf32>
    %4 = vector.multi_reduction <add>, %3, %cst [1] : vector<8x32xf32> to vector<8xf32>
    %5 = vector.shape_cast %4 : vector<8xf32> to vector<8x1xf32>
    %c0_3 = arith.constant 0 : index
    %c0_4 = arith.constant 0 : index
    %6 = memref.load %arg3[%c0_3, %c0_4] : memref<1x1xf32, #tpu.memory_space<smem>>
    %7 = vector.broadcast %6 : f32 to vector<8x1xf32>
    %8 = arith.addf %5, %7 : vector<8x1xf32>
    %c0_5 = arith.constant 0 : index
    %c0_6 = arith.constant 0 : index
    %9 = vector.load %arg4[%c0_5, %c0_6] : memref<8x1xf32, #tpu.memory_space<vmem>>, vector<8x1xf32>
    tpu.vector_store %arg4[%c0_5, %c0_6], %8 {strides = array<i32>} : memref<8x1xf32, #tpu.memory_space<vmem>>, vector<8x1xf32>,
    return
  }
  func.func @transform_0(%arg0: i32) -> (i32, i32) {
    %c0_i32 = arith.constant 0 : i32
    %c0_i32_0 = arith.constant 0 : i32
    return %arg0, %c0_i32 : i32, i32
  }
  func.func @transform_1(%arg0: i32) -> (i32, i32) {
    %c0_i32 = arith.constant 0 : i32
    %c0_i32_0 = arith.constant 0 : i32
    %c0_i32_1 = arith.constant 0 : i32
    return %c0_i32, %c0_i32_0 : i32, i32
  }
  func.func @transform_2(%arg0: i32) -> (i32, i32) {
    %c0_i32 = arith.constant 0 : i32
    %c0_i32_0 = arith.constant 0 : i32
    %c0_i32_1 = arith.constant 0 : i32
    return %c0_i32, %c0_i32_0 : i32, i32
  }
  func.func @transform_3(%arg0: i32) -> (i32, i32) {
    %c0_i32 = arith.constant 0 : i32
    %c0_i32_0 = arith.constant 0 : i32
    return %arg0, %c0_i32 : i32, i32
  }
}

</mosaic_0001>

<bundles_post_ra>
// kernel: tpu_custom_call.1
= control target key start
LH: loop header
LB: loop body
LE: loop exit
PB: predicated region body
PF: predicated region fallthrough
CT: control target
= control target key end

     0   :  { %9 = vsyncpa [#allocation4], 0  ;;  %s76_s12 = smov [#allocation3]   ;;  %s118_s0 = inlined_call_operand.hbm [shape: f32[8,32], index: 0, kind: input, shape index: {}]   ;;  %s119_s1 = inlined_call_operand.vmem [shape: f32[1,32], index: 1, kind: input, shape index: {}]   ;;  %s120_s2 = inlined_call_operand.<no memory space> [shape: f32[1,1], index: 2, kind: input, shape index: {}]   ;;  %s121_s3 = inlined_call_operand.vmem [shape: f32[8,1], index: 3, kind: output, shape index: {}]  }
   0x1   :  { %s16_s13 = sshll.u32 %s76_s12, 4  ;;  %s52_s16 = scalar_lea.hbm %s118_s0, 128  ;;  %s17_s13 = int_to_ptr.vmem [resolvable:$true] %s16_s13 }
   0x2   :  { %p53_p0 = scmp.ne.s32.totalorder %s118_s0, %s52_s16  ;;  %p56_p1 = scmp.lt.u32.totalorder %s52_s16, %s118_s0 }
   0x4   :  { %p58_p2 = pnand %p56_p1, %p53_p0 }
   0x6   :  { %61 = shalt.err (!%p58_p2)
}
   0x7   :  { %s62_s21 = scalar_lea.vmem %s17_s13, 128  ;;  %p67_p4 = scmp.lt.s32.totalorder %s17_s13, %s17_s13 }
   0x8   :  { %p63_p3 = scmp.ne.s32.totalorder %s17_s13, %s62_s21  ;;  %p68_p5 = scmp.lt.s32.totalorder %s62_s21, %s62_s21 }
   0xa   :  { %p69_p6 = por %p68_p5, %p67_p4 }
   0xc   :  { %p70_p7 = pnand %p69_p6, %p63_p3 }
   0xe   :  { %73 = shalt.err (!%p70_p7)
}
   0xf   :  { %19 = dma.hbm_to_vmem [thread:$0]  %s118_s0, 128, %s17_s13, [#allocation4]  }
  0x10   :  { %74 = dma.done.wait [#allocation4], 128  }
  0x11   :  { %75 = vsyncadd [#allocation4], 4294967168  ;;  %v27_v0 = vld [vmem:[#allocation3] sm:$0xff]  ;;  %vm36_vm0 = vcmask 261120   ;;  %v41_v4 = vstv %s120_s2  ;;  %vm43_vm1 = vcmask 7168  }
  0x12   :  { %v50_v1 = vld [vmem:[%s119_s1] ss:$0 sm:$0xff] }
  0x13   :  { %v35_v2 = vmul.f32 %v50_v1, %v27_v0 }
  0x15   :  { %v37_v3 = vsel %vm36_vm0, %v35_v2, 0.0 }
  0x16   :  { %38 = vadd.xlane.f32.xlu0 %v37_v3 }
  0xa3   :  { %v39_v5 = vpop.xlane.xlu0 %38 }
  0xa4   :  { %v42_v6 = vadd.f32 %v41_v4, %v39_v5 }
  0xa6   :  { %44 = vst.msk [vmem:[%s121_s3] sm:$0xff] %vm43_vm1, %v42_v6 }
  0xa7   :  { %49 = vsyncpa [#allocation4], 1 }

</bundles_post_ra>
